<compile_context>
chip_gen: v6e
topology: v6e:2x2x1
jax: 0.10.0
libtpu: 0.0.40
codegen_flags: <defaults>
</compile_context>

<pallas_src>
import functools

import numpy as np
import jax
import jax.numpy as jnp
from jax.experimental import pallas as pl
from jax.experimental.pallas import tpu as pltpu


# ----------------------------------------------------------------------------
# Per-ROI separable pooling operators (vectorized JAX, runs once per level)
# ----------------------------------------------------------------------------
def _roi_pool_operators(rois, spatial_scale, sampling_ratio, out_h, out_w, H, W):
    """rois: (R, 5) float (batch, x1, y1, x2, y2).

    Returns Ey (R, out_h, H) and Ex (R, out_w, W) such that, for ROI r and a
    single-channel map F (H, W),  Ey[r] @ F @ Ex[r].T  reproduces torchvision
    roi_align (aligned=False, fixed positive sampling_ratio).
    """
    sr = int(sampling_ratio)
    x1 = rois[:, 1] * spatial_scale
    y1 = rois[:, 2] * spatial_scale
    x2 = rois[:, 3] * spatial_scale
    y2 = rois[:, 4] * spatial_scale
    roi_w = jnp.maximum(x2 - x1, 1.0)
    roi_h = jnp.maximum(y2 - y1, 1.0)

    def axis_weights(start, roi_size, n_out, dim):
        bin_size = roi_size / float(n_out)                                   # (R,)
        s = jnp.arange(n_out * sr, dtype=jnp.float32)                        # (S,)
        coord = start[:, None] + bin_size[:, None] * (s[None, :] + 0.5) / float(sr)
        empty = (coord < -1.0) | (coord > float(dim))                        # (R, S)
        coord = jnp.maximum(coord, 0.0)
        low = jnp.floor(coord)
        at_edge = low >= float(dim - 1)
        low = jnp.where(at_edge, float(dim - 1), low)
        coord = jnp.where(at_edge, low, coord)
        high = jnp.where(at_edge, low, low + 1.0)
        frac = coord - low
        d = jnp.arange(dim, dtype=jnp.float32)                               # (dim,)
        w = ((1.0 - frac)[..., None] * (d == low[..., None])
             + frac[..., None] * (d == high[..., None]))                     # (R, S, dim)
        w = jnp.where(empty[..., None], 0.0, w)
        # fold the 1/sr average over the sr samples of each output bin
        w = w.reshape(w.shape[0], n_out, sr, dim).sum(axis=2) / float(sr)
        return w.astype(jnp.float32)                                         # (R, n_out, dim)

    ey = axis_weights(y1, roi_h, out_h, H)                                   # (R, out_h, H)
    ex = axis_weights(x1, roi_w, out_w, W)                                   # (R, out_w, W)
    return ey, ex


def _vmem_limit_bytes(default=32 * 1024 * 1024, want=64 * 1024 * 1024):
    """Never request the whole per-core VMEM (v7x has only 64 MiB/TC)."""
    try:
        cap = int(pltpu.get_tpu_info().vmem_capacity_bytes)
        return int(min(want, (cap * 3) // 4))
    except Exception:
        return default


# ----------------------------------------------------------------------------
# Pallas kernel: RB ROIs of one image per grid step
# ----------------------------------------------------------------------------
def _roi_align_kernel(img_ref, eyb_ref, exb_ref, feat_ref, out_ref,
                      t1_ref, tr_ref, *, rb, out_h, out_w, C, W):
    del img_ref  # only consumed by the index_maps (feature slab selection)

    # Big y-contraction for all RB ROIs of this chunk at once (channels folded into
    # the lane dim): (RB*out_h, H) @ (H, C*W) -> (RB*out_h, C*W), f32 accumulation.
    t1_ref[...] = jnp.dot(eyb_ref[0], feat_ref[0],
                          preferred_element_type=jnp.float32).astype(t1_ref.dtype)

    for r in range(rb):
        # Re-layout this ROI's slab (out_h, C*W) -> (C*out_h, W) via VMEM scratch.
        # TODO(synk): for large C replace these C slice copies with one XLU relayout
        # (pltpu.einshape) so the vector-store slot is not the binding unit.
        for c in range(C):
            tr_ref[c * out_h:(c + 1) * out_h, :] = (
                t1_ref[r * out_h:(r + 1) * out_h, c * W:(c + 1) * W])

        # Small x-contraction as an NT matmul -> lane-dense (out_w, C*out_h) result.
        ex_r = exb_ref[0, r * out_w:(r + 1) * out_w, :]                      # (out_w, W)
        res = jax.lax.dot_general(ex_r, tr_ref[...],
                                  (((1,), (1,)), ((), ())),
                                  preferred_element_type=jnp.float32)
        out_ref[0, r * out_w:(r + 1) * out_w, :] = res.astype(out_ref.dtype)


def roi_align_level_pallas(feature, rois, levels, level, output_size,
                           spatial_scale, sampling_ratio,
                           slot_src, slot_valid, chunk_img, rb):
    """RoIAlign of one FPN level for all (padded) ROI slots.

    ROIs of other levels and padding slots contribute exact zeros (their Ey rows are
    zeroed), so per-level outputs can simply be summed by the caller.
    Returns (R_pad, C, out_h, out_w).
    """
    N, C, H, W = feature.shape
    out_h, out_w = output_size
    R_pad = int(slot_src.shape[0])
    G = int(chunk_img.shape[0])
    cdt = feature.dtype

    ey, ex = _roi_pool_operators(rois, spatial_scale, sampling_ratio,
                                 out_h, out_w, H, W)

    # Gather into padded chunk order; zero ROIs that are padding or another level.
    keep = jnp.asarray(slot_valid) & (levels[slot_src] == level)             # (R_pad,)
    ey_pad = ey[slot_src] * keep[:, None, None].astype(ey.dtype)             # (R_pad, oh, H)
    ex_pad = ex[slot_src]                                                    # (R_pad, ow, W)

    # Pre-cast operators to the feature dtype (bf16 features -> bf16 MXU operands,
    # no in-kernel casts); chunk-batched layouts for the kernel.
    eyb = ey_pad.reshape(G, rb * out_h, H).astype(cdt)
    exb = ex_pad.reshape(G, rb * out_w, W).astype(cdt)

    # (N, C, H, W) -> (N, H, C*W): image-selectable, y-contraction-friendly layout.
    feat_hcw = jnp.transpose(feature, (0, 2, 1, 3)).reshape(N, H, C * W)
    chunk_img_j = jnp.asarray(chunk_img, dtype=jnp.int32)

    kernel = functools.partial(_roi_align_kernel, rb=int(rb), out_h=int(out_h),
                               out_w=int(out_w), C=int(C), W=int(W))

    grid_spec = pltpu.PrefetchScalarGridSpec(
        num_scalar_prefetch=1,                       # chunk -> image id (SMEM)
        grid=(G,),
        in_specs=[
            pl.BlockSpec((1, rb * out_h, H), lambda g, img: (g, 0, 0)),       # EyB
            pl.BlockSpec((1, rb * out_w, W), lambda g, img: (g, 0, 0)),       # ExB
            # TODO(synk): fetch only the ROI chunk's vertical band of rows instead of
            # the full (H, C*W) slab to cut HBM read traffic on large FPN levels.
            pl.BlockSpec((1, H, C * W), lambda g, img: (img[g], 0, 0)),       # feature
        ],
        out_specs=pl.BlockSpec((1, rb * out_w, C * out_h), lambda g, img: (g, 0, 0)),
        scratch_shapes=[
            pltpu.VMEM((rb * out_h, C * W), cdt),    # batched y-contraction result
            pltpu.VMEM((C * out_h, W), cdt),         # per-ROI rearranged slab
        ],
    )

    isz = jnp.dtype(feature.dtype).itemsize
    osz = jnp.dtype(cdt).itemsize
    # Consecutive chunks of the same image reuse the feature block (no re-DMA), so
    # bytes reflect the number of distinct image slabs actually fetched.
    n_img_fetch = int(len(np.unique(chunk_img))) if G else 0
    flops = int(2 * G * rb * C * (out_h * H * W + out_h * W * out_w))
    bytes_accessed = int(n_img_fetch * H * C * W * isz
                         + (eyb.size + exb.size) * osz
                         + G * rb * out_w * C * out_h * isz)

    out = pl.pallas_call(
        kernel,
        out_shape=jax.ShapeDtypeStruct((G, rb * out_w, C * out_h), feature.dtype),
        grid_spec=grid_spec,
        compiler_params=pltpu.CompilerParams(
            # ROI chunks are independent; on v7x the contiguous grid halves go to the
            # two TensorCores (chunks are roughly balanced by construction).
            dimension_semantics=("parallel",),
            vmem_limit_bytes=_vmem_limit_bytes(),
        ),
        cost_estimate=pl.CostEstimate(flops=flops, transcendentals=0,
                                      bytes_accessed=bytes_accessed),
    )(chunk_img_j, eyb, exb, feat_hcw)

    # (G, RB*out_w, C*out_h) -> (R_pad, C, out_h, out_w)   (pure XLA layout plumbing)
    out = out.reshape(G, rb, out_w, C, out_h).transpose(0, 1, 3, 4, 2)
    return out.reshape(R_pad, C, out_h, out_w)


# ----------------------------------------------------------------------------
# Module-level glue, mirroring the PyTorch MultiScaleRoIAlign
# ----------------------------------------------------------------------------
class MultiScaleRoIAlignPallas:
    def __init__(self, output_size, sampling_ratio=2, rois_per_step=8):
        if isinstance(output_size, int):
            output_size = (output_size, output_size)
        self.output_size = tuple(output_size)
        self.sampling_ratio = int(sampling_ratio)
        self.rois_per_step = int(rois_per_step)
        # TODO(synk): torchvision's adaptive sampling grid (sampling_ratio <= 0) is
        # not supported.
        assert self.sampling_ratio > 0

    def _convert_to_roi_format(self, bboxes):
        concat = jnp.concatenate(bboxes, axis=0)
        ids = jnp.concatenate(
            [jnp.full((b.shape[0], 1), float(i), dtype=concat.dtype)
             for i, b in enumerate(bboxes)], axis=0)
        return jnp.concatenate([ids, concat], axis=-1)

    def _generate_split_areas(self, anchor_sizes):
        split_areas = []
        areas = [np.inf]
        for i in range(len(anchor_sizes) - 1):
            s = (min(anchor_sizes[i]) + max(anchor_sizes[i + 1])) / 2.0
            areas.append(s * s)
        areas.append(-np.inf)
        for i in range(len(areas) - 1):
            split_areas.append([areas[i + 1], areas[i]])
        return split_areas

    def compute_levels(self, rois, anchor_sizes):
        split_areas = self._generate_split_areas(anchor_sizes)
        areas = (rois[:, 4] - rois[:, 2]) * (rois[:, 3] - rois[:, 1])
        levels = jnp.zeros(areas.shape, dtype=jnp.int32)
        for idx, (s_min, s_max) in enumerate(split_areas):
            levels = jnp.where((areas >= s_min) & (areas < s_max), idx, levels)
        return levels

    @staticmethod
    def _build_chunks(counts, rb):
        """Static per-image ROI chunking (counts are static Python ints)."""
        slot_src, slot_valid, chunk_img, roi_slot = [], [], [], []
        base = 0
        for img, n in enumerate(counts):
            if n == 0:
                continue
            n_pad = ((n + rb - 1) // rb) * rb
            for k in range(n_pad):
                if k < n:
                    roi_slot.append(len(slot_src))
                    slot_src.append(base + k)
                    slot_valid.append(True)
                else:
                    slot_src.append(base)        # arbitrary real index; gets zeroed
                    slot_valid.append(False)
            chunk_img.extend([img] * (n_pad // rb))
            base += n
        return (np.asarray(slot_src, np.int32),
                np.asarray(slot_valid, np.bool_),
                np.asarray(chunk_img, np.int32),
                np.asarray(roi_slot, np.int32))

    def __call__(self, features, bboxes, anchor_sizes, strides):
        assert len(features) == len(anchor_sizes) == len(strides)
        scales = [1.0 / s for s in strides]
        rois = self._convert_to_roi_format(bboxes)
        counts = [int(b.shape[0]) for b in bboxes]
        R = int(sum(counts))
        C = features[0].shape[1]
        out_h, out_w = self.output_size
        if R == 0:
            return jnp.zeros((0, C, out_h, out_w), features[0].dtype)

        slot_src, slot_valid, chunk_img, roi_slot = self._build_chunks(
            counts, self.rois_per_step)

        if len(features) == 1:
            levels = jnp.zeros((R,), dtype=jnp.int32)
        else:
            levels = self.compute_levels(rois, anchor_sizes)

        # Each ROI matches exactly one level; all other levels contribute exact zeros
        # (their Ey rows are zeroed inside the glue), so summing per-level partials is
        # equivalent to the per-level scatter in the PyTorch module.
        result_pad = None
        for level in range(len(features)):
            per_level = roi_align_level_pallas(
                features[level], rois, levels, level, self.output_size,
                scales[level], self.sampling_ratio,
                slot_src, slot_valid, chunk_img, self.rois_per_step)
            result_pad = per_level if result_pad is None else result_pad + per_level
        return result_pad[roi_slot]                 # drop padding slots


# ----------------------------------------------------------------------------
# Pure-JAX reference (built from the same separable operators) for a self-check
# ----------------------------------------------------------------------------
def _reference_multiscale_roi_align(features, rois, batch_ids, levels,
                                    output_size, scales, sampling_ratio):
    out_h, out_w = output_size
    R = rois.shape[0]
    C = features[0].shape[1]
    result = jnp.zeros((R, C, out_h, out_w), jnp.float32)
    for level, (feat, scale) in enumerate(zip(features, scales)):
        _, _, H, W = feat.shape
        ey, ex = _roi_pool_operators(rois, scale, sampling_ratio, out_h, out_w, H, W)
        per_img = feat[batch_ids].astype(jnp.float32)            # (R, C, H, W)
        pooled = jnp.einsum('ryh,rchw,rjw->rcyj', ey, per_img, ex)
        mask = (levels == level)[:, None, None, None]
        result = result + jnp.where(mask, pooled, 0.0)
    return result.astype(features[0].dtype)


# ----------------------------------------------------------------------------
# Demo
# ----------------------------------------------------------------------------
if __name__ == "__main__":
    key = jax.random.PRNGKey(0)
    keys = jax.random.split(key, 8)

    N, C = 2, 4
    img_size = 64
    strides = [16, 8, 4]                           # large -> small anchors
    anchor_sizes = [(64,), (32,), (16,)]
    feat_shapes = [(N, C, img_size // s, img_size // s) for s in strides]
    features = [jax.random.normal(keys[i], shp, dtype=jnp.float32)
                for i, shp in enumerate(feat_shapes)]

    def make_boxes(k, n):
        k1, k2 = jax.random.split(k)
        xy = jax.random.uniform(k1, (n, 2), minval=0.0, maxval=40.0)
        wh = jax.random.uniform(k2, (n, 2), minval=4.0, maxval=60.0)
        x2y2 = jnp.minimum(xy + wh, float(img_size))
        return jnp.concatenate([xy, x2y2], axis=-1).astype(jnp.float32)

    bboxes = [make_boxes(keys[5], 3), make_boxes(keys[6], 5)]

    module = MultiScaleRoIAlignPallas(output_size=4, sampling_ratio=2, rois_per_step=8)
    out = module(features, bboxes, anchor_sizes, strides)
    out = jax.block_until_ready(out)
    assert out.shape == (8, C, 4, 4)

    # Self-check against a pure-JAX reference using the same pooling operators.
    rois = module._convert_to_roi_format(bboxes)
    batch_ids = jnp.concatenate(
        [jnp.full((b.shape[0],), i, dtype=jnp.int32) for i, b in enumerate(bboxes)])
    levels = module.compute_levels(rois, anchor_sizes)
    ref = _reference_multiscale_roi_align(features, rois, batch_ids, levels,
                                          (4, 4), [1.0 / s for s in strides], 2)
    np.testing.assert_allclose(np.asarray(out), np.asarray(ref), rtol=1e-3, atol=1e-3)

    print("KERNEL_OK")
</pallas_src>

<mosaic_0001>
module attributes {stable_mosaic.version = 11 : i64} {
  func.func @_roi_align_kernel(%arg0: i32, %arg1: memref<2xi32, #tpu.memory_space<smem>>, %arg2: memref<1x32x4xf32, #tpu.memory_space<vmem>>, %arg3: memref<1x32x4xf32, #tpu.memory_space<vmem>>, %arg4: memref<1x4x16xf32, #tpu.memory_space<vmem>>, %arg5: memref<1x32x16xf32, #tpu.memory_space<vmem>>, %arg6: memref<32x16xf32, #tpu.memory_space<vmem>>, %arg7: memref<16x4xf32, #tpu.memory_space<vmem>>) attributes {dimension_semantics = [#tpu.dimension_semantics<parallel>], iteration_bounds = array<i64: 2>, scalar_prefetch = 1 : i64, scratch_operands = 2 : i64, tpu.core_type = #tpu.core_type<tc>, window_params = [{transform_indices = @transform_0, window_bounds = array<i64: 1, 32, 4>}, {transform_indices = @transform_1, window_bounds = array<i64: 1, 32, 4>}, {transform_indices = @transform_2, window_bounds = array<i64: 1, 4, 16>}, {transform_indices = @transform_3, window_bounds = array<i64: 1, 32, 16>}]} {
    %c0 = arith.constant 0 : index
    %c0_0 = arith.constant 0 : index
    %c0_1 = arith.constant 0 : index
    %0 = vector.load %arg2[%c0, %c0_0, %c0_1] : memref<1x32x4xf32, #tpu.memory_space<vmem>>, vector<1x32x4xf32>
    %1 = vector.shape_cast %0 : vector<1x32x4xf32> to vector<32x4xf32>
    %c0_2 = arith.constant 0 : index
    %c0_3 = arith.constant 0 : index
    %c0_4 = arith.constant 0 : index
    %2 = vector.load %arg4[%c0_2, %c0_3, %c0_4] : memref<1x4x16xf32, #tpu.memory_space<vmem>>, vector<1x4x16xf32>
    %3 = vector.shape_cast %2 : vector<1x4x16xf32> to vector<4x16xf32>
    %cst = arith.constant dense<0.000000e+00> : vector<32x16xf32>
    %4 = tpu.matmul %1, %3, %cst {dimension_numbers = #tpu.dot_dimension_numbers<[1], [0], [0], [1], [0, 0, 1, 1], [], []>} : vector<32x4xf32>, vector<4x16xf32>, vector<32x16xf32> -> vector<32x16xf32>
    %c0_5 = arith.constant 0 : index
    %c0_6 = arith.constant 0 : index
    %5 = vector.load %arg6[%c0_5, %c0_6] : memref<32x16xf32, #tpu.memory_space<vmem>>, vector<32x16xf32>
    tpu.vector_store %arg6[%c0_5, %c0_6], %4 {strides = array<i32>} : memref<32x16xf32, #tpu.memory_space<vmem>>, vector<32x16xf32>,
    %c0_7 = arith.constant 0 : index
    %c0_8 = arith.constant 0 : index
    %6 = vector.load %arg6[%c0_7, %c0_8] : memref<32x16xf32, #tpu.memory_space<vmem>>, vector<4x4xf32>
    %c0_9 = arith.constant 0 : index
    %c0_10 = arith.constant 0 : index
    %7 = vector.load %arg7[%c0_9, %c0_10] : memref<16x4xf32, #tpu.memory_space<vmem>>, vector<4x4xf32>
    tpu.vector_store %arg7[%c0_9, %c0_10], %6 {strides = array<i32>} : memref<16x4xf32, #tpu.memory_space<vmem>>, vector<4x4xf32>,
    %c0_11 = arith.constant 0 : index
    %c4 = arith.constant 4 : index
    %8 = vector.load %arg6[%c0_11, %c4] : memref<32x16xf32, #tpu.memory_space<vmem>>, vector<4x4xf32>
    %c4_12 = arith.constant 4 : index
    %c0_13 = arith.constant 0 : index
    %9 = vector.load %arg7[%c4_12, %c0_13] : memref<16x4xf32, #tpu.memory_space<vmem>>, vector<4x4xf32>
    tpu.vector_store %arg7[%c4_12, %c0_13], %8 {strides = array<i32>} : memref<16x4xf32, #tpu.memory_space<vmem>>, vector<4x4xf32>,
    %c0_14 = arith.constant 0 : index
    %c8 = arith.constant 8 : index
    %10 = vector.load %arg6[%c0_14, %c8] : memref<32x16xf32, #tpu.memory_space<vmem>>, vector<4x4xf32>
    %c8_15 = arith.constant 8 : index
    %c0_16 = arith.constant 0 : index
    %11 = vector.load %arg7[%c8_15, %c0_16] : memref<16x4xf32, #tpu.memory_space<vmem>>, vector<4x4xf32>
    tpu.vector_store %arg7[%c8_15, %c0_16], %10 {strides = array<i32>} : memref<16x4xf32, #tpu.memory_space<vmem>>, vector<4x4xf32>,
    %c0_17 = arith.constant 0 : index
    %c12 = arith.constant 12 : index
    %12 = vector.load %arg6[%c0_17, %c12] : memref<32x16xf32, #tpu.memory_space<vmem>>, vector<4x4xf32>
    %c12_18 = arith.constant 12 : index
    %c0_19 = arith.constant 0 : index
    %13 = vector.load %arg7[%c12_18, %c0_19] : memref<16x4xf32, #tpu.memory_space<vmem>>, vector<4x4xf32>
    tpu.vector_store %arg7[%c12_18, %c0_19], %12 {strides = array<i32>} : memref<16x4xf32, #tpu.memory_space<vmem>>, vector<4x4xf32>,
    %c0_20 = arith.constant 0 : index
    %c0_21 = arith.constant 0 : index
    %c0_22 = arith.constant 0 : index
    %14 = vector.load %arg3[%c0_20, %c0_21, %c0_22] : memref<1x32x4xf32, #tpu.memory_space<vmem>>, vector<1x4x4xf32>
    %15 = vector.shape_cast %14 : vector<1x4x4xf32> to vector<4x4xf32>
    %c0_23 = arith.constant 0 : index
    %c0_24 = arith.constant 0 : index
    %16 = vector.load %arg7[%c0_23, %c0_24] : memref<16x4xf32, #tpu.memory_space<vmem>>, vector<16x4xf32>
    %cst_25 = arith.constant dense<0.000000e+00> : vector<4x16xf32>
    %17 = tpu.matmul %15, %16, %cst_25 {dimension_numbers = #tpu.dot_dimension_numbers<[1], [1], [0], [0], [0, 0, 1, 0], [], []>} : vector<4x4xf32>, vector<16x4xf32>, vector<4x16xf32> -> vector<4x16xf32>
    %c0_26 = arith.constant 0 : index
    %c0_27 = arith.constant 0 : index
    %c0_28 = arith.constant 0 : index
    %18 = vector.load %arg5[%c0_26, %c0_27, %c0_28] : memref<1x32x16xf32, #tpu.memory_space<vmem>>, vector<1x4x16xf32>
    %19 = vector.shape_cast %18 : vector<1x4x16xf32> to vector<4x16xf32>
    %20 = vector.shape_cast %17 : vector<4x16xf32> to vector<1x4x16xf32>
    tpu.vector_store %arg5[%c0_26, %c0_27, %c0_28], %20 {strides = array<i32>} : memref<1x32x16xf32, #tpu.memory_space<vmem>>, vector<1x4x16xf32>,
    %c4_29 = arith.constant 4 : index
    %c0_30 = arith.constant 0 : index
    %21 = vector.load %arg6[%c4_29, %c0_30] : memref<32x16xf32, #tpu.memory_space<vmem>>, vector<4x4xf32>
    %c0_31 = arith.constant 0 : index
    %c0_32 = arith.constant 0 : index
    %22 = vector.load %arg7[%c0_31, %c0_32] : memref<16x4xf32, #tpu.memory_space<vmem>>, vector<4x4xf32>
    tpu.vector_store %arg7[%c0_31, %c0_32], %21 {strides = array<i32>} : memref<16x4xf32, #tpu.memory_space<vmem>>, vector<4x4xf32>,
    %c4_33 = arith.constant 4 : index
    %c4_34 = arith.constant 4 : index
    %23 = vector.load %arg6[%c4_33, %c4_34] : memref<32x16xf32, #tpu.memory_space<vmem>>, vector<4x4xf32>
    %c4_35 = arith.constant 4 : index
    %c0_36 = arith.constant 0 : index
    %24 = vector.load %arg7[%c4_35, %c0_36] : memref<16x4xf32, #tpu.memory_space<vmem>>, vector<4x4xf32>
    tpu.vector_store %arg7[%c4_35, %c0_36], %23 {strides = array<i32>} : memref<16x4xf32, #tpu.memory_space<vmem>>, vector<4x4xf32>,
    %c4_37 = arith.constant 4 : index
    %c8_38 = arith.constant 8 : index
    %25 = vector.load %arg6[%c4_37, %c8_38] : memref<32x16xf32, #tpu.memory_space<vmem>>, vector<4x4xf32>
    %c8_39 = arith.constant 8 : index
    %c0_40 = arith.constant 0 : index
    %26 = vector.load %arg7[%c8_39, %c0_40] : memref<16x4xf32, #tpu.memory_space<vmem>>, vector<4x4xf32>
    tpu.vector_store %arg7[%c8_39, %c0_40], %25 {strides = array<i32>} : memref<16x4xf32, #tpu.memory_space<vmem>>, vector<4x4xf32>,
    %c4_41 = arith.constant 4 : index
    %c12_42 = arith.constant 12 : index
    %27 = vector.load %arg6[%c4_41, %c12_42] : memref<32x16xf32, #tpu.memory_space<vmem>>, vector<4x4xf32>
    %c12_43 = arith.constant 12 : index
    %c0_44 = arith.constant 0 : index
    %28 = vector.load %arg7[%c12_43, %c0_44] : memref<16x4xf32, #tpu.memory_space<vmem>>, vector<4x4xf32>
    tpu.vector_store %arg7[%c12_43, %c0_44], %27 {strides = array<i32>} : memref<16x4xf32, #tpu.memory_space<vmem>>, vector<4x4xf32>,
    %c0_45 = arith.constant 0 : index
    %c4_46 = arith.constant 4 : index
    %c0_47 = arith.constant 0 : index
    %29 = vector.load %arg3[%c0_45, %c4_46, %c0_47] : memref<1x32x4xf32, #tpu.memory_space<vmem>>, vector<1x4x4xf32>
    %30 = vector.shape_cast %29 : vector<1x4x4xf32> to vector<4x4xf32>
    %c0_48 = arith.constant 0 : index
    %c0_49 = arith.constant 0 : index
    %31 = vector.load %arg7[%c0_48, %c0_49] : memref<16x4xf32, #tpu.memory_space<vmem>>, vector<16x4xf32>
    %cst_50 = arith.constant dense<0.000000e+00> : vector<4x16xf32>
    %32 = tpu.matmul %30, %31, %cst_50 {dimension_numbers = #tpu.dot_dimension_numbers<[1], [1], [0], [0], [0, 0, 1, 0], [], []>} : vector<4x4xf32>, vector<16x4xf32>, vector<4x16xf32> -> vector<4x16xf32>
    %c0_51 = arith.constant 0 : index
    %c4_52 = arith.constant 4 : index
    %c0_53 = arith.constant 0 : index
    %33 = vector.load %arg5[%c0_51, %c4_52, %c0_53] : memref<1x32x16xf32, #tpu.memory_space<vmem>>, vector<1x4x16xf32>
    %34 = vector.shape_cast %33 : vector<1x4x16xf32> to vector<4x16xf32>
    %35 = vector.shape_cast %32 : vector<4x16xf32> to vector<1x4x16xf32>
    tpu.vector_store %arg5[%c0_51, %c4_52, %c0_53], %35 {strides = array<i32>} : memref<1x32x16xf32, #tpu.memory_space<vmem>>, vector<1x4x16xf32>,
    %c8_54 = arith.constant 8 : index
    %c0_55 = arith.constant 0 : index
    %36 = vector.load %arg6[%c8_54, %c0_55] : memref<32x16xf32, #tpu.memory_space<vmem>>, vector<4x4xf32>
    %c0_56 = arith.constant 0 : index
    %c0_57 = arith.constant 0 : index
    %37 = vector.load %arg7[%c0_56, %c0_57] : memref<16x4xf32, #tpu.memory_space<vmem>>, vector<4x4xf32>
    tpu.vector_store %arg7[%c0_56, %c0_57], %36 {strides = array<i32>} : memref<16x4xf32, #tpu.memory_space<vmem>>, vector<4x4xf32>,
    %c8_58 = arith.constant 8 : index
    %c4_59 = arith.constant 4 : index
    %38 = vector.load %arg6[%c8_58, %c4_59] : memref<32x16xf32, #tpu.memory_space<vmem>>, vector<4x4xf32>
    %c4_60 = arith.constant 4 : index
    %c0_61 = arith.constant 0 : index
    %39 = vector.load %arg7[%c4_60, %c0_61] : memref<16x4xf32, #tpu.memory_space<vmem>>, vector<4x4xf32>
    tpu.vector_store %arg7[%c4_60, %c0_61], %38 {strides = array<i32>} : memref<16x4xf32, #tpu.memory_space<vmem>>, vector<4x4xf32>,
    %c8_62 = arith.constant 8 : index
    %c8_63 = arith.constant 8 : index
    %40 = vector.load %arg6[%c8_62, %c8_63] : memref<32x16xf32, #tpu.memory_space<vmem>>, vector<4x4xf32>
    %c8_64 = arith.constant 8 : index
    %c0_65 = arith.constant 0 : index
    %41 = vector.load %arg7[%c8_64, %c0_65] : memref<16x4xf32, #tpu.memory_space<vmem>>, vector<4x4xf32>
    tpu.vector_store %arg7[%c8_64, %c0_65], %40 {strides = array<i32>} : memref<16x4xf32, #tpu.memory_space<vmem>>, vector<4x4xf32>,
    %c8_66 = arith.constant 8 : index
    %c12_67 = arith.constant 12 : index
    %42 = vector.load %arg6[%c8_66, %c12_67] : memref<32x16xf32, #tpu.memory_space<vmem>>, vector<4x4xf32>
    %c12_68 = arith.constant 12 : index
    %c0_69 = arith.constant 0 : index
    %43 = vector.load %arg7[%c12_68, %c0_69] : memref<16x4xf32, #tpu.memory_space<vmem>>, vector<4x4xf32>
    tpu.vector_store %arg7[%c12_68, %c0_69], %42 {strides = array<i32>} : memref<16x4xf32, #tpu.memory_space<vmem>>, vector<4x4xf32>,
    %c0_70 = arith.constant 0 : index
    %c8_71 = arith.constant 8 : index
    %c0_72 = arith.constant 0 : index
    %44 = vector.load %arg3[%c0_70, %c8_71, %c0_72] : memref<1x32x4xf32, #tpu.memory_space<vmem>>, vector<1x4x4xf32>
    %45 = vector.shape_cast %44 : vector<1x4x4xf32> to vector<4x4xf32>
    %c0_73 = arith.constant 0 : index
    %c0_74 = arith.constant 0 : index
    %46 = vector.load %arg7[%c0_73, %c0_74] : memref<16x4xf32, #tpu.memory_space<vmem>>, vector<16x4xf32>
    %cst_75 = arith.constant dense<0.000000e+00> : vector<4x16xf32>
    %47 = tpu.matmul %45, %46, %cst_75 {dimension_numbers = #tpu.dot_dimension_numbers<[1], [1], [0], [0], [0, 0, 1, 0], [], []>} : vector<4x4xf32>, vector<16x4xf32>, vector<4x16xf32> -> vector<4x16xf32>
    %c0_76 = arith.constant 0 : index
    %c8_77 = arith.constant 8 : index
    %c0_78 = arith.constant 0 : index
    %48 = vector.load %arg5[%c0_76, %c8_77, %c0_78] : memref<1x32x16xf32, #tpu.memory_space<vmem>>, vector<1x4x16xf32>
    %49 = vector.shape_cast %48 : vector<1x4x16xf32> to vector<4x16xf32>
    %50 = vector.shape_cast %47 : vector<4x16xf32> to vector<1x4x16xf32>
    tpu.vector_store %arg5[%c0_76, %c8_77, %c0_78], %50 {strides = array<i32>} : memref<1x32x16xf32, #tpu.memory_space<vmem>>, vector<1x4x16xf32>,
    %c12_79 = arith.constant 12 : index
    %c0_80 = arith.constant 0 : index
    %51 = vector.load %arg6[%c12_79, %c0_80] : memref<32x16xf32, #tpu.memory_space<vmem>>, vector<4x4xf32>
    %c0_81 = arith.constant 0 : index
    %c0_82 = arith.constant 0 : index
    %52 = vector.load %arg7[%c0_81, %c0_82] : memref<16x4xf32, #tpu.memory_space<vmem>>, vector<4x4xf32>
    tpu.vector_store %arg7[%c0_81, %c0_82], %51 {strides = array<i32>} : memref<16x4xf32, #tpu.memory_space<vmem>>, vector<4x4xf32>,
    %c12_83 = arith.constant 12 : index
    %c4_84 = arith.constant 4 : index
    %53 = vector.load %arg6[%c12_83, %c4_84] : memref<32x16xf32, #tpu.memory_space<vmem>>, vector<4x4xf32>
    %c4_85 = arith.constant 4 : index
    %c0_86 = arith.constant 0 : index
    %54 = vector.load %arg7[%c4_85, %c0_86] : memref<16x4xf32, #tpu.memory_space<vmem>>, vector<4x4xf32>
    tpu.vector_store %arg7[%c4_85, %c0_86], %53 {strides = array<i32>} : memref<16x4xf32, #tpu.memory_space<vmem>>, vector<4x4xf32>,
    %c12_87 = arith.constant 12 : index
    %c8_88 = arith.constant 8 : index
    %55 = vector.load %arg6[%c12_87, %c8_88] : memref<32x16xf32, #tpu.memory_space<vmem>>, vector<4x4xf32>
    %c8_89 = arith.constant 8 : index
    %c0_90 = arith.constant 0 : index
    %56 = vector.load %arg7[%c8_89, %c0_90] : memref<16x4xf32, #tpu.memory_space<vmem>>, vector<4x4xf32>
    tpu.vector_store %arg7[%c8_89, %c0_90], %55 {strides = array<i32>} : memref<16x4xf32, #tpu.memory_space<vmem>>, vector<4x4xf32>,
    %c12_91 = arith.constant 12 : index
    %c12_92 = arith.constant 12 : index
    %57 = vector.load %arg6[%c12_91, %c12_92] : memref<32x16xf32, #tpu.memory_space<vmem>>, vector<4x4xf32>
    %c12_93 = arith.constant 12 : index
    %c0_94 = arith.constant 0 : index
    %58 = vector.load %arg7[%c12_93, %c0_94] : memref<16x4xf32, #tpu.memory_space<vmem>>, vector<4x4xf32>
    tpu.vector_store %arg7[%c12_93, %c0_94], %57 {strides = array<i32>} : memref<16x4xf32, #tpu.memory_space<vmem>>, vector<4x4xf32>,
    %c0_95 = arith.constant 0 : index
    %c12_96 = arith.constant 12 : index
    %c0_97 = arith.constant 0 : index
    %59 = vector.load %arg3[%c0_95, %c12_96, %c0_97] : memref<1x32x4xf32, #tpu.memory_space<vmem>>, vector<1x4x4xf32>
    %60 = vector.shape_cast %59 : vector<1x4x4xf32> to vector<4x4xf32>
    %c0_98 = arith.constant 0 : index
    %c0_99 = arith.constant 0 : index
    %61 = vector.load %arg7[%c0_98, %c0_99] : memref<16x4xf32, #tpu.memory_space<vmem>>, vector<16x4xf32>
    %cst_100 = arith.constant dense<0.000000e+00> : vector<4x16xf32>
    %62 = tpu.matmul %60, %61, %cst_100 {dimension_numbers = #tpu.dot_dimension_numbers<[1], [1], [0], [0], [0, 0, 1, 0], [], []>} : vector<4x4xf32>, vector<16x4xf32>, vector<4x16xf32> -> vector<4x16xf32>
    %c0_101 = arith.constant 0 : index
    %c12_102 = arith.constant 12 : index
    %c0_103 = arith.constant 0 : index
    %63 = vector.load %arg5[%c0_101, %c12_102, %c0_103] : memref<1x32x16xf32, #tpu.memory_space<vmem>>, vector<1x4x16xf32>
    %64 = vector.shape_cast %63 : vector<1x4x16xf32> to vector<4x16xf32>
    %65 = vector.shape_cast %62 : vector<4x16xf32> to vector<1x4x16xf32>
    tpu.vector_store %arg5[%c0_101, %c12_102, %c0_103], %65 {strides = array<i32>} : memref<1x32x16xf32, #tpu.memory_space<vmem>>, vector<1x4x16xf32>,
    %c16 = arith.constant 16 : index
    %c0_104 = arith.constant 0 : index
    %66 = vector.load %arg6[%c16, %c0_104] : memref<32x16xf32, #tpu.memory_space<vmem>>, vector<4x4xf32>
    %c0_105 = arith.constant 0 : index
    %c0_106 = arith.constant 0 : index
    %67 = vector.load %arg7[%c0_105, %c0_106] : memref<16x4xf32, #tpu.memory_space<vmem>>, vector<4x4xf32>
    tpu.vector_store %arg7[%c0_105, %c0_106], %66 {strides = array<i32>} : memref<16x4xf32, #tpu.memory_space<vmem>>, vector<4x4xf32>,
    %c16_107 = arith.constant 16 : index
    %c4_108 = arith.constant 4 : index
    %68 = vector.load %arg6[%c16_107, %c4_108] : memref<32x16xf32, #tpu.memory_space<vmem>>, vector<4x4xf32>
    %c4_109 = arith.constant 4 : index
    %c0_110 = arith.constant 0 : index
    %69 = vector.load %arg7[%c4_109, %c0_110] : memref<16x4xf32, #tpu.memory_space<vmem>>, vector<4x4xf32>
    tpu.vector_store %arg7[%c4_109, %c0_110], %68 {strides = array<i32>} : memref<16x4xf32, #tpu.memory_space<vmem>>, vector<4x4xf32>,
    %c16_111 = arith.constant 16 : index
    %c8_112 = arith.constant 8 : index
    %70 = vector.load %arg6[%c16_111, %c8_112] : memref<32x16xf32, #tpu.memory_space<vmem>>, vector<4x4xf32>
    %c8_113 = arith.constant 8 : index
    %c0_114 = arith.constant 0 : index
    %71 = vector.load %arg7[%c8_113, %c0_114] : memref<16x4xf32, #tpu.memory_space<vmem>>, vector<4x4xf32>
    tpu.vector_store %arg7[%c8_113, %c0_114], %70 {strides = array<i32>} : memref<16x4xf32, #tpu.memory_space<vmem>>, vector<4x4xf32>,
    %c16_115 = arith.constant 16 : index
    %c12_116 = arith.constant 12 : index
    %72 = vector.load %arg6[%c16_115, %c12_116] : memref<32x16xf32, #tpu.memory_space<vmem>>, vector<4x4xf32>
    %c12_117 = arith.constant 12 : index
    %c0_118 = arith.constant 0 : index
    %73 = vector.load %arg7[%c12_117, %c0_118] : memref<16x4xf32, #tpu.memory_space<vmem>>, vector<4x4xf32>
    tpu.vector_store %arg7[%c12_117, %c0_118], %72 {strides = array<i32>} : memref<16x4xf32, #tpu.memory_space<vmem>>, vector<4x4xf32>,
    %c0_119 = arith.constant 0 : index
    %c16_120 = arith.constant 16 : index
    %c0_121 = arith.constant 0 : index
    %74 = vector.load %arg3[%c0_119, %c16_120, %c0_121] : memref<1x32x4xf32, #tpu.memory_space<vmem>>, vector<1x4x4xf32>
    %75 = vector.shape_cast %74 : vector<1x4x4xf32> to vector<4x4xf32>
    %c0_122 = arith.constant 0 : index
    %c0_123 = arith.constant 0 : index
    %76 = vector.load %arg7[%c0_122, %c0_123] : memref<16x4xf32, #tpu.memory_space<vmem>>, vector<16x4xf32>
    %cst_124 = arith.constant dense<0.000000e+00> : vector<4x16xf32>
    %77 = tpu.matmul %75, %76, %cst_124 {dimension_numbers = #tpu.dot_dimension_numbers<[1], [1], [0], [0], [0, 0, 1, 0], [], []>} : vector<4x4xf32>, vector<16x4xf32>, vector<4x16xf32> -> vector<4x16xf32>
    %c0_125 = arith.constant 0 : index
    %c16_126 = arith.constant 16 : index
    %c0_127 = arith.constant 0 : index
    %78 = vector.load %arg5[%c0_125, %c16_126, %c0_127] : memref<1x32x16xf32, #tpu.memory_space<vmem>>, vector<1x4x16xf32>
    %79 = vector.shape_cast %78 : vector<1x4x16xf32> to vector<4x16xf32>
    %80 = vector.shape_cast %77 : vector<4x16xf32> to vector<1x4x16xf32>
    tpu.vector_store %arg5[%c0_125, %c16_126, %c0_127], %80 {strides = array<i32>} : memref<1x32x16xf32, #tpu.memory_space<vmem>>, vector<1x4x16xf32>,
    %c20 = arith.constant 20 : index
    %c0_128 = arith.constant 0 : index
    %81 = vector.load %arg6[%c20, %c0_128] : memref<32x16xf32, #tpu.memory_space<vmem>>, vector<4x4xf32>
    %c0_129 = arith.constant 0 : index
    %c0_130 = arith.constant 0 : index
    %82 = vector.load %arg7[%c0_129, %c0_130] : memref<16x4xf32, #tpu.memory_space<vmem>>, vector<4x4xf32>
    tpu.vector_store %arg7[%c0_129, %c0_130], %81 {strides = array<i32>} : memref<16x4xf32, #tpu.memory_space<vmem>>, vector<4x4xf32>,
    %c20_131 = arith.constant 20 : index
    %c4_132 = arith.constant 4 : index
    %83 = vector.load %arg6[%c20_131, %c4_132] : memref<32x16xf32, #tpu.memory_space<vmem>>, vector<4x4xf32>
    %c4_133 = arith.constant 4 : index
    %c0_134 = arith.constant 0 : index
    %84 = vector.load %arg7[%c4_133, %c0_134] : memref<16x4xf32, #tpu.memory_space<vmem>>, vector<4x4xf32>
    tpu.vector_store %arg7[%c4_133, %c0_134], %83 {strides = array<i32>} : memref<16x4xf32, #tpu.memory_space<vmem>>, vector<4x4xf32>,
    %c20_135 = arith.constant 20 : index
    %c8_136 = arith.constant 8 : index
    %85 = vector.load %arg6[%c20_135, %c8_136] : memref<32x16xf32, #tpu.memory_space<vmem>>, vector<4x4xf32>
    %c8_137 = arith.constant 8 : index
    %c0_138 = arith.constant 0 : index
    %86 = vector.load %arg7[%c8_137, %c0_138] : memref<16x4xf32, #tpu.memory_space<vmem>>, vector<4x4xf32>
    tpu.vector_store %arg7[%c8_137, %c0_138], %85 {strides = array<i32>} : memref<16x4xf32, #tpu.memory_space<vmem>>, vector<4x4xf32>,
    %c20_139 = arith.constant 20 : index
    %c12_140 = arith.constant 12 : index
    %87 = vector.load %arg6[%c20_139, %c12_140] : memref<32x16xf32, #tpu.memory_space<vmem>>, vector<4x4xf32>
    %c12_141 = arith.constant 12 : index
    %c0_142 = arith.constant 0 : index
    %88 = vector.load %arg7[%c12_141, %c0_142] : memref<16x4xf32, #tpu.memory_space<vmem>>, vector<4x4xf32>
    tpu.vector_store %arg7[%c12_141, %c0_142], %87 {strides = array<i32>} : memref<16x4xf32, #tpu.memory_space<vmem>>, vector<4x4xf32>,
    %c0_143 = arith.constant 0 : index
    %c20_144 = arith.constant 20 : index
    %c0_145 = arith.constant 0 : index
    %89 = vector.load %arg3[%c0_143, %c20_144, %c0_145] : memref<1x32x4xf32, #tpu.memory_space<vmem>>, vector<1x4x4xf32>
    %90 = vector.shape_cast %89 : vector<1x4x4xf32> to vector<4x4xf32>
    %c0_146 = arith.constant 0 : index
    %c0_147 = arith.constant 0 : index
    %91 = vector.load %arg7[%c0_146, %c0_147] : memref<16x4xf32, #tpu.memory_space<vmem>>, vector<16x4xf32>
    %cst_148 = arith.constant dense<0.000000e+00> : vector<4x16xf32>
    %92 = tpu.matmul %90, %91, %cst_148 {dimension_numbers = #tpu.dot_dimension_numbers<[1], [1], [0], [0], [0, 0, 1, 0], [], []>} : vector<4x4xf32>, vector<16x4xf32>, vector<4x16xf32> -> vector<4x16xf32>
    %c0_149 = arith.constant 0 : index
    %c20_150 = arith.constant 20 : index
    %c0_151 = arith.constant 0 : index
    %93 = vector.load %arg5[%c0_149, %c20_150, %c0_151] : memref<1x32x16xf32, #tpu.memory_space<vmem>>, vector<1x4x16xf32>
    %94 = vector.shape_cast %93 : vector<1x4x16xf32> to vector<4x16xf32>
    %95 = vector.shape_cast %92 : vector<4x16xf32> to vector<1x4x16xf32>
    tpu.vector_store %arg5[%c0_149, %c20_150, %c0_151], %95 {strides = array<i32>} : memref<1x32x16xf32, #tpu.memory_space<vmem>>, vector<1x4x16xf32>,
    %c24 = arith.constant 24 : index
    %c0_152 = arith.constant 0 : index
    %96 = vector.load %arg6[%c24, %c0_152] : memref<32x16xf32, #tpu.memory_space<vmem>>, vector<4x4xf32>
    %c0_153 = arith.constant 0 : index
    %c0_154 = arith.constant 0 : index
    %97 = vector.load %arg7[%c0_153, %c0_154] : memref<16x4xf32, #tpu.memory_space<vmem>>, vector<4x4xf32>
    tpu.vector_store %arg7[%c0_153, %c0_154], %96 {strides = array<i32>} : memref<16x4xf32, #tpu.memory_space<vmem>>, vector<4x4xf32>,
    %c24_155 = arith.constant 24 : index
    %c4_156 = arith.constant 4 : index
    %98 = vector.load %arg6[%c24_155, %c4_156] : memref<32x16xf32, #tpu.memory_space<vmem>>, vector<4x4xf32>
    %c4_157 = arith.constant 4 : index
    %c0_158 = arith.constant 0 : index
    %99 = vector.load %arg7[%c4_157, %c0_158] : memref<16x4xf32, #tpu.memory_space<vmem>>, vector<4x4xf32>
    tpu.vector_store %arg7[%c4_157, %c0_158], %98 {strides = array<i32>} : memref<16x4xf32, #tpu.memory_space<vmem>>, vector<4x4xf32>,
    %c24_159 = arith.constant 24 : index
    %c8_160 = arith.constant 8 : index
    %100 = vector.load %arg6[%c24_159, %c8_160] : memref<32x16xf32, #tpu.memory_space<vmem>>, vector<4x4xf32>
    %c8_161 = arith.constant 8 : index
    %c0_162 = arith.constant 0 : index
    %101 = vector.load %arg7[%c8_161, %c0_162] : memref<16x4xf32, #tpu.memory_space<vmem>>, vector<4x4xf32>
    tpu.vector_store %arg7[%c8_161, %c0_162], %100 {strides = array<i32>} : memref<16x4xf32, #tpu.memory_space<vmem>>, vector<4x4xf32>,
    %c24_163 = arith.constant 24 : index
    %c12_164 = arith.constant 12 : index
    %102 = vector.load %arg6[%c24_163, %c12_164] : memref<32x16xf32, #tpu.memory_space<vmem>>, vector<4x4xf32>
    %c12_165 = arith.constant 12 : index
    %c0_166 = arith.constant 0 : index
    %103 = vector.load %arg7[%c12_165, %c0_166] : memref<16x4xf32, #tpu.memory_space<vmem>>, vector<4x4xf32>
    tpu.vector_store %arg7[%c12_165, %c0_166], %102 {strides = array<i32>} : memref<16x4xf32, #tpu.memory_space<vmem>>, vector<4x4xf32>,
    %c0_167 = arith.constant 0 : index
    %c24_168 = arith.constant 24 : index
    %c0_169 = arith.constant 0 : index
    %104 = vector.load %arg3[%c0_167, %c24_168, %c0_169] : memref<1x32x4xf32, #tpu.memory_space<vmem>>, vector<1x4x4xf32>
    %105 = vector.shape_cast %104 : vector<1x4x4xf32> to vector<4x4xf32>
    %c0_170 = arith.constant 0 : index
    %c0_171 = arith.constant 0 : index
    %106 = vector.load %arg7[%c0_170, %c0_171] : memref<16x4xf32, #tpu.memory_space<vmem>>, vector<16x4xf32>
    %cst_172 = arith.constant dense<0.000000e+00> : vector<4x16xf32>
    %107 = tpu.matmul %105, %106, %cst_172 {dimension_numbers = #tpu.dot_dimension_numbers<[1], [1], [0], [0], [0, 0, 1, 0], [], []>} : vector<4x4xf32>, vector<16x4xf32>, vector<4x16xf32> -> vector<4x16xf32>
    %c0_173 = arith.constant 0 : index
    %c24_174 = arith.constant 24 : index
    %c0_175 = arith.constant 0 : index
    %108 = vector.load %arg5[%c0_173, %c24_174, %c0_175] : memref<1x32x16xf32, #tpu.memory_space<vmem>>, vector<1x4x16xf32>
    %109 = vector.shape_cast %108 : vector<1x4x16xf32> to vector<4x16xf32>
    %110 = vector.shape_cast %107 : vector<4x16xf32> to vector<1x4x16xf32>
    tpu.vector_store %arg5[%c0_173, %c24_174, %c0_175], %110 {strides = array<i32>} : memref<1x32x16xf32, #tpu.memory_space<vmem>>, vector<1x4x16xf32>,
    %c28 = arith.constant 28 : index
    %c0_176 = arith.constant 0 : index
    %111 = vector.load %arg6[%c28, %c0_176] : memref<32x16xf32, #tpu.memory_space<vmem>>, vector<4x4xf32>
    %c0_177 = arith.constant 0 : index
    %c0_178 = arith.constant 0 : index
    %112 = vector.load %arg7[%c0_177, %c0_178] : memref<16x4xf32, #tpu.memory_space<vmem>>, vector<4x4xf32>
    tpu.vector_store %arg7[%c0_177, %c0_178], %111 {strides = array<i32>} : memref<16x4xf32, #tpu.memory_space<vmem>>, vector<4x4xf32>,
    %c28_179 = arith.constant 28 : index
    %c4_180 = arith.constant 4 : index
    %113 = vector.load %arg6[%c28_179, %c4_180] : memref<32x16xf32, #tpu.memory_space<vmem>>, vector<4x4xf32>
    %c4_181 = arith.constant 4 : index
    %c0_182 = arith.constant 0 : index
    %114 = vector.load %arg7[%c4_181, %c0_182] : memref<16x4xf32, #tpu.memory_space<vmem>>, vector<4x4xf32>
    tpu.vector_store %arg7[%c4_181, %c0_182], %113 {strides = array<i32>} : memref<16x4xf32, #tpu.memory_space<vmem>>, vector<4x4xf32>,
    %c28_183 = arith.constant 28 : index
    %c8_184 = arith.constant 8 : index
    %115 = vector.load %arg6[%c28_183, %c8_184] : memref<32x16xf32, #tpu.memory_space<vmem>>, vector<4x4xf32>
    %c8_185 = arith.constant 8 : index
    %c0_186 = arith.constant 0 : index
    %116 = vector.load %arg7[%c8_185, %c0_186] : memref<16x4xf32, #tpu.memory_space<vmem>>, vector<4x4xf32>
    tpu.vector_store %arg7[%c8_185, %c0_186], %115 {strides = array<i32>} : memref<16x4xf32, #tpu.memory_space<vmem>>, vector<4x4xf32>,
    %c28_187 = arith.constant 28 : index
    %c12_188 = arith.constant 12 : index
    %117 = vector.load %arg6[%c28_187, %c12_188] : memref<32x16xf32, #tpu.memory_space<vmem>>, vector<4x4xf32>
    %c12_189 = arith.constant 12 : index
    %c0_190 = arith.constant 0 : index
    %118 = vector.load %arg7[%c12_189, %c0_190] : memref<16x4xf32, #tpu.memory_space<vmem>>, vector<4x4xf32>
    tpu.vector_store %arg7[%c12_189, %c0_190], %117 {strides = array<i32>} : memref<16x4xf32, #tpu.memory_space<vmem>>, vector<4x4xf32>,
    %c0_191 = arith.constant 0 : index
    %c28_192 = arith.constant 28 : index
    %c0_193 = arith.constant 0 : index
    %119 = vector.load %arg3[%c0_191, %c28_192, %c0_193] : memref<1x32x4xf32, #tpu.memory_space<vmem>>, vector<1x4x4xf32>
    %120 = vector.shape_cast %119 : vector<1x4x4xf32> to vector<4x4xf32>
    %c0_194 = arith.constant 0 : index
    %c0_195 = arith.constant 0 : index
    %121 = vector.load %arg7[%c0_194, %c0_195] : memref<16x4xf32, #tpu.memory_space<vmem>>, vector<16x4xf32>
    %cst_196 = arith.constant dense<0.000000e+00> : vector<4x16xf32>
    %122 = tpu.matmul %120, %121, %cst_196 {dimension_numbers = #tpu.dot_dimension_numbers<[1], [1], [0], [0], [0, 0, 1, 0], [], []>} : vector<4x4xf32>, vector<16x4xf32>, vector<4x16xf32> -> vector<4x16xf32>
    %c0_197 = arith.constant 0 : index
    %c28_198 = arith.constant 28 : index
    %c0_199 = arith.constant 0 : index
    %123 = vector.load %arg5[%c0_197, %c28_198, %c0_199] : memref<1x32x16xf32, #tpu.memory_space<vmem>>, vector<1x4x16xf32>
    %124 = vector.shape_cast %123 : vector<1x4x16xf32> to vector<4x16xf32>
    %125 = vector.shape_cast %122 : vector<4x16xf32> to vector<1x4x16xf32>
    tpu.vector_store %arg5[%c0_197, %c28_198, %c0_199], %125 {strides = array<i32>} : memref<1x32x16xf32, #tpu.memory_space<vmem>>, vector<1x4x16xf32>,
    return
  }
  func.func @transform_0(%arg0: i32, %arg1: memref<2xi32, #tpu.memory_space<smem>>) -> (i32, i32, i32) {
    %c0_i32 = arith.constant 0 : i32
    %c0_i32_0 = arith.constant 0 : i32
    %c0_i32_1 = arith.constant 0 : i32
    return %arg0, %c0_i32, %c0_i32_0 : i32, i32, i32
  }
  func.func @transform_1(%arg0: i32, %arg1: memref<2xi32, #tpu.memory_space<smem>>) -> (i32, i32, i32) {
    %c0_i32 = arith.constant 0 : i32
    %c0_i32_0 = arith.constant 0 : i32
    %c0_i32_1 = arith.constant 0 : i32
    return %arg0, %c0_i32, %c0_i32_0 : i32, i32, i32
  }
  func.func @transform_2(%arg0: i32, %arg1: memref<2xi32, #tpu.memory_space<smem>>) -> (i32, i32, i32) {
    %0 = arith.index_cast %arg0 : i32 to index
    %1 = memref.load %arg1[%0] : memref<2xi32, #tpu.memory_space<smem>>
    %c0_i32 = arith.constant 0 : i32
    %c0_i32_0 = arith.constant 0 : i32
    %c0_i32_1 = arith.constant 0 : i32
    return %1, %c0_i32, %c0_i32_0 : i32, i32, i32
  }
  func.func @transform_3(%arg0: i32, %arg1: memref<2xi32, #tpu.memory_space<smem>>) -> (i32, i32, i32) {
    %c0_i32 = arith.constant 0 : i32
    %c0_i32_0 = arith.constant 0 : i32
    %c0_i32_1 = arith.constant 0 : i32
    return %arg0, %c0_i32, %c0_i32_0 : i32, i32, i32
  }
}

</mosaic_0001>

<bundles_post_ra>
// kernel: tpu_custom_call.1
= control target key start
LH: loop header
LB: loop body
LE: loop exit
PB: predicated region body
PF: predicated region fallthrough
CT: control target
= control target key end

     0   :  { %s1610_s0 = inlined_call_operand.vmem [shape: s32[2], index: 0, kind: input, shape index: {}]   ;;  %s1611_s1 = inlined_call_operand.vmem [shape: f32[2,32,4], index: 1, kind: input, shape index: {}]   ;;  %s1612_s2 = inlined_call_operand.vmem [shape: f32[2,32,4], index: 2, kind: input, shape index: {}]   ;;  %s1613_s3 = inlined_call_operand.vmem [shape: f32[2,4,16], index: 3, kind: input, shape index: {}]   ;;  %s1614_s4 = inlined_call_operand.vmem [shape: f32[2,32,16], index: 4, kind: output, shape index: {}]  }
   0x1   :  { %s9_s17 = sshll.u32 %s1610_s0, 4  ;;  %s10_s17 = int_to_ptr.vmem [resolvable:$true] %s9_s17 }
   0x2   :  { %s1392_s18 = scalar_lea.vmem %s10_s17, 16  ;;  %p1397_p1 = scmp.lt.s32.totalorder %s10_s17, %s10_s17 }
   0x3   :  { %p1393_p0 = scmp.ne.s32.totalorder %s10_s17, %s1392_s18  ;;  %p1398_p2 = scmp.lt.s32.totalorder %s1392_s18, %s1392_s18 }
   0x5   :  { %p1399_p3 = por %p1398_p2, %p1397_p1 }
   0x7   :  { %p1400_p4 = pnand %p1399_p3, %p1393_p0 }
   0x9   :  { %1403 = shalt.err (!%p1400_p4)  }
   0xa   :  { %s1414_s19 = smov [#allocation5]  }
   0xb   :  { %12 = dma.vmem_to_smem %s10_s17, 16, %s1414_s19, [#allocation4] }
   0xc   :  { %1408 = dma.done.wait [#allocation4], 16 }
   0xd   :  { %1409 = vsyncadd [#allocation4], 4294967280 }
   0xe   :  { %14 = sfence }
   0xf   :  { %s1448_s20 = smov 0  }
  0x10 LB: > { %s1239_s0 = sadd.s32 4294967295, %s1412_s20   ;;  %p1243_p5 = scmp.ge.s32.totalorder %s1412_s20, 1  ;;  %s1412_s20 = sphi %s1448_s20, %s20_s20  }
  0x11   : > { %p167_p6 = scmp.lt.s32.totalorder %s1412_s20, 3 }
  0x13   : > { %p168_p7 = pnand %p1243_p5, %p167_p6 }
  0x14   : > { %s211_s21 = sld [smem:[#allocation5 + %s1239_s0]] (!%p168_p7)  ;;  %p201_p8 = scmp.lt.s32.totalorder (!%p168_p7), %s1239_s0, 1 }
  0x15   : > { %171 = sbr.rel (%p168_p7) target bundleno = 623 (0x26f), region = 32  ;;  %s1415_s30 = smov (!%p168_p7), 120  }
  0x16   : > { %s1416_s5 = smov (!%p168_p7), 124   ;;  %s1417_s6 = smov (!%p168_p7), 116  }
  0x1a   : > { %s1616_s0 = smov (!%p201_p8, %s1239_s0), 1  ;;  %vm227_vm0 = vcmask 31744   ;;  %p212_p9 = scmp.lt.s32.totalorder %s211_s21, 1  ;;  %vm240_vm1 = vcmask 1043456   ;;  %vm329_vm2 = vcmask 130048   ;;  %vm335_vm3 = vcmask 27648  }
  0x1b   : > { %s1456_s22 = sshll.u32 %s1616_s0, 5  ;;  %v1418_v16 = vmov 0.0   ;;  %vm1419_vm4 = vmmov 0   ;;  %vm437_vm5 = vcmask 125952  }
  0x1c   : > { %s205_s25 = scalar_lea.vmem %s1611_s1, %s1456_s22  ;;  %s1618_s21 = smov (!%p212_p9, %s211_s21), 1  ;;  %1322 = vmatprep.subr.mxu1 %v1418_v16  ;;  %1326 = vmatprep.mubr.msk.f32.mxu1 %vm1419_vm4, %v1418_v16 }
  0x1d   : > { %v222_v0 = vld [vmem:[%s205_s25] sm:$0xff]  ;;  %s1248_s26 = sshll.u32 %s1618_s21, 2  ;;  %v223_v2 = vld [vmem:[%s205_s25 + $0x8] sm:$0xff]  ;;  %v224_v3 = vld [vmem:[%s205_s25 + $0x10] sm:$0xff]  ;;  %s1512_s9 = scalar_lea.vmem %s1612_s2, %s1456_s22 }
  0x1e   : > { %1316 = vmatprep.mubr.msk.f32.mxu0 %vm227_vm0, %v222_v0  ;;  %s215_s29 = scalar_lea.vmem %s1613_s3, %s1248_s26  ;;  %v225_v4 = vld [vmem:[%s205_s25 + $0x18] sm:$0xff]  ;;  %v355_v50 = vld [vmem:[%s1512_s9] sm:$0xf]  ;;  %v459_v57 = vld [vmem:[%s1512_s9 + $0x4] sm:$0xf]  ;;  %s221_s12 = scalar_lea.vmem %s1614_s4, %s1456_s22 }
  0x1f   : > { %v226_v1 = vld [vmem:[%s215_s29] sm:$0xf]  ;;  %v562_v0 = vld [vmem:[%s1512_s9 + $0x8] sm:$0xf] }
  0x20   : > { %1314 = vmatprep.subr.msk.mxu0 %vm240_vm1, %v226_v1 }
  0x21   : > { %1315 = vmatpush3.msk.msra.mxu0 %vm240_vm1, %v226_v1 }
  0x22   : > { %1317 = vmatmul.mubr.msk.f32.vlgmr.msra.gmra.mxu0 %vm227_vm0, %v223_v2  ;;  %1329 = vmatprep.subr.mxu0 %v1418_v16 }
  0x23   : > { %1319 = vmatprep.mubr.msk.f32.mxu0 %vm227_vm0, %v224_v3 }
  0x26   : > { %1320 = vmatmul.mubr.msk.f32.gmra.mxu0 %vm227_vm0, %v225_v4 }
  0x27   : > { %1333 = vmatprep.mubr.msk.f32.mxu0 %vm1419_vm4, %v1418_v16 }
  0xe2   : > { %v1318_v5 = vpop.f32.mrf.mxu0 }
  0xe3   : > { %331 = vst.msk [vmem:[#allocation2 + $0x8] sm:$0xff] %vm329_vm2, %v1318_v5 }
  0xe4   : > { %v310_v6 = vpop.f32.mrf.mxu0 }
  0xe5   : > { %330 = vst.msk [vmem:[#allocation2] sm:$0xff] %vm329_vm2, %v310_v6  ;;  %v665_v6 = vld [vmem:[%s1512_s9 + $0xc] sm:$0xf] }
  0xe6   : > { %v1321_v7 = vpop.f32.mrf.mxu0 }
  0xe7   : > { %333 = vst.msk [vmem:[#allocation2 + $0x18] sm:$0xff] %vm329_vm2, %v1321_v7 }
  0xe8   : > { %v320_v8 = vpop.f32.mrf.mxu0 }
  0xe9   : > { %332 = vst.msk [vmem:[#allocation2 + $0x10] sm:$0xff] %vm329_vm2, %v320_v8 }
  0xea   : > { %v550_v17 = vld [vmem:[#allocation2 + $0x8] sm:$0xf]  ;;  %v653_v20 = vld [vmem:[#allocation2 + $0xc] sm:$0xf] }
  0xeb   : > { %v556_v18 = vld [vmem:[#allocation2 + $0x8] sm:$0xf]  ;;  %v659_v21 = vld [vmem:[#allocation2 + $0xc] sm:$0xf] }
  0xec   : > { %v334_v9 = vld [vmem:[#allocation2] sm:$0xf]  ;;  %v447_v13 = vld [vmem:[#allocation2 + $0x4] sm:$0xf]  ;;  %v544_v19 = vld [vmem:[#allocation2 + $0x8] sm:$0xf] }
  0xed   : > { %v343_v10 = vld [vmem:[#allocation2] sm:$0xf]  ;;  %336 = vst.msk [vmem:[#allocation3] sm:$0xf] %vm335_vm3, %v334_v9  ;;  %v453_v14 = vld [vmem:[#allocation2 + $0x4] sm:$0xf] }
  0xee   : > { %345 = vrot.lane.b32.xlu0 %v343_v10, %s1415_s30  ;;  %v337_v11 = vld [vmem:[#allocation2] sm:$0xf]  ;;  %v441_v15 = vld [vmem:[#allocation2 + $0x4] sm:$0xf]  ;;  %v647_v22 = vld [vmem:[#allocation2 + $0xc] sm:$0xf] }
  0xef   : > { %339 = vrot.lane.b32.xlu1 %v337_v11, %s1416_s5  ;;  %v349_v12 = vld [vmem:[#allocation2] sm:$0xf]  ;;  %v962_v29 = vld [vmem:[#allocation2 + $0x18] sm:$0xf]  ;;  %v1065_v32 = vld [vmem:[#allocation2 + $0x1c] sm:$0xf] }
  0xf0   : > { %v756_v23 = vld [vmem:[#allocation2 + $0x10] sm:$0xf]  ;;  %v859_v26 = vld [vmem:[#allocation2 + $0x14] sm:$0xf]  ;;  %v968_v30 = vld [vmem:[#allocation2 + $0x18] sm:$0xf] }
  0xf1   : > { %v762_v24 = vld [vmem:[#allocation2 + $0x10] sm:$0xf]  ;;  %v865_v27 = vld [vmem:[#allocation2 + $0x14] sm:$0xf]  ;;  %v956_v31 = vld [vmem:[#allocation2 + $0x18] sm:$0xf] }
  0xf2   : > { %351 = vrot.lane.b32.xlu0 %v349_v12, %s1417_s6  ;;  %v750_v25 = vld [vmem:[#allocation2 + $0x10] sm:$0xf]  ;;  %v853_v28 = vld [vmem:[#allocation2 + $0x14] sm:$0xf]  ;;  %v1071_v33 = vld [vmem:[#allocation2 + $0x1c] sm:$0xf] }
  0xf3   : > { %449 = vrot.lane.b32.xlu1 %v447_v13, %s1415_s30  ;;  %v1059_v34 = vld [vmem:[#allocation2 + $0x1c] sm:$0xf]  ;;  %v439_v40 = vld [vmem:[#allocation2 + $0x4] sm:$0xf]  ;;  %v542_v47 = vld [vmem:[#allocation2 + $0x8] sm:$0xf] }
  0xf4   : > { %v645_v54 = vld [vmem:[#allocation2 + $0xc] sm:$0xf]  ;;  %v748_v61 = vld [vmem:[#allocation2 + $0x10] sm:$0xf]  ;;  %v851_v4 = vld [vmem:[#allocation2 + $0x14] sm:$0xf] }
  0xf5   : > { %v954_v10 = vld [vmem:[#allocation2 + $0x18] sm:$0xf]  ;;  %v768_v13 = vld [vmem:[%s1512_s9 + $0x10] sm:$0xf] }
  0xf6   : > { %455 = vrot.lane.b32.xlu0 %v453_v14, %s1417_s6 }
  0xf7   : > { %443 = vrot.lane.b32.xlu1 %v441_v15, %s1416_s5 }
  0xfa   : > { %552 = vrot.lane.b32.xlu0 %v550_v17, %s1415_s30  ;;  %v1057_v17 = vld [vmem:[#allocation2 + $0x1c] sm:$0xf] }
  0xfb   : > { %558 = vrot.lane.b32.xlu1 %v556_v18, %s1417_s6 }
  0xfe   : > { %546 = vrot.lane.b32.xlu0 %v544_v19, %s1416_s5 }
  0xff   : > { %655 = vrot.lane.b32.xlu1 %v653_v20, %s1415_s30  ;;  %v871_v20 = vld [vmem:[%s1512_s9 + $0x14] sm:$0xf] }
 0x102   : > { %661 = vrot.lane.b32.xlu0 %v659_v21, %s1417_s6 }
 0x103   : > { %649 = vrot.lane.b32.xlu1 %v647_v22, %s1416_s5 }
 0x106   : > { %758 = vrot.lane.b32.xlu0 %v756_v23, %s1415_s30  ;;  %v974_v23 = vld [vmem:[%s1512_s9 + $0x18] sm:$0xf] }
 0x107   : > { %764 = vrot.lane.b32.xlu1 %v762_v24, %s1417_s6 }
 0x10a   : > { %752 = vrot.lane.b32.xlu0 %v750_v25, %s1416_s5 }
 0x10b   : > { %861 = vrot.lane.b32.xlu1 %v859_v26, %s1415_s30  ;;  %v1077_v26 = vld [vmem:[%s1512_s9 + $0x1c] sm:$0xf] }
 0x10e   : > { %867 = vrot.lane.b32.xlu0 %v865_v27, %s1417_s6 }
 0x10f   : > { %855 = vrot.lane.b32.xlu1 %v853_v28, %s1416_s5 }
 0x112   : > { %964 = vrot.lane.b32.xlu0 %v962_v29, %s1415_s30 }
 0x113   : > { %970 = vrot.lane.b32.xlu1 %v968_v30, %s1417_s6 }
 0x116   : > { %958 = vrot.lane.b32.xlu0 %v956_v31, %s1416_s5 }
 0x117   : > { %1067 = vrot.lane.b32.xlu1 %v1065_v32, %s1415_s30 }
 0x11a   : > { %1073 = vrot.lane.b32.xlu0 %v1071_v33, %s1417_s6 }
 0x11b   : > { %1061 = vrot.lane.b32.xlu1 %v1059_v34, %s1416_s5 }
 0x160   : > { %v346_v35 = vpop.permute.xlu0 %345 }
 0x161   : > { %348 = vst.msk [vmem:[#allocation3 + $0x8] sm:$0xf] %vm335_vm3, %v346_v35  ;;  %v340_v36 = vpop.permute.xlu1 %339 }
 0x162   : > { %342 = vst.msk [vmem:[#allocation3 + $0x4] sm:$0xf] %vm335_vm3, %v340_v36 }
 0x164   : > { %v352_v37 = vpop.permute.xlu0 %351 }
 0x165   : > { %354 = vst.msk [vmem:[#allocation3 + $0xc] sm:$0xf] %vm335_vm3, %v352_v37  ;;  %v450_v38 = vpop.permute.xlu1 %449 }
 0x168   : > { %v456_v39 = vpop.permute.xlu0 %455 }
 0x169   : > { %v356_v41 = vld [vmem:[#allocation3] sm:$0xff]  ;;  %v444_v42 = vpop.permute.xlu1 %443 }
 0x16a   : > { %440 = vst.msk [vmem:[#allocation3] sm:$0xf] %vm335_vm3, %v439_v40  ;;  %446 = vst.msk [vmem:[#allocation3 + $0x4] sm:$0xf] %vm335_vm3, %v444_v42 }
 0x16c   : > { %v357_v43 = vld [vmem:[#allocation3 + $0x8] sm:$0xff]  ;;  %v553_v44 = vpop.permute.xlu0 %552 }
 0x16d   : > { %452 = vst.msk [vmem:[#allocation3 + $0x8] sm:$0xf] %vm335_vm3, %v450_v38  ;;  %458 = vst.msk [vmem:[#allocation3 + $0xc] sm:$0xf] %vm335_vm3, %v456_v39  ;;  %v559_v45 = vpop.permute.xlu1 %558  ;;  %1323 = vmatpush3.xpose.msk.msra.mxu1 %vm227_vm0, %v357_v43 }
 0x16e   : > { %1324 = vmatprep.subr.mxu1 %v1418_v16 }
 0x170   : > { %v547_v46 = vpop.permute.xlu0 %546 }
 0x171   : > { %v460_v48 = vld [vmem:[#allocation3] sm:$0xff]  ;;  %v656_v49 = vpop.permute.xlu1 %655  ;;  %1325 = vmatpush3.xpose.msk.msra.mxu1 %vm227_vm0, %v356_v41 }
 0x172   : > { %543 = vst.msk [vmem:[#allocation3] sm:$0xf] %vm335_vm3, %v542_v47  ;;  %549 = vst.msk [vmem:[#allocation3 + $0x4] sm:$0xf] %vm335_vm3, %v547_v46  ;;  %1336 = vmatprep.subr.mxu1 %v1418_v16 }
 0x174   : > { %v461_v51 = vld [vmem:[#allocation3 + $0x8] sm:$0xff]  ;;  %v662_v52 = vpop.permute.xlu0 %661  ;;  %1327 = vmatmul.mubr.msk.f32.vlgmr.msra.gmra.mxu1 %vm227_vm0, %v355_v50 }
 0x175   : > { %555 = vst.msk [vmem:[#allocation3 + $0x8] sm:$0xf] %vm335_vm3, %v553_v44  ;;  %561 = vst.msk [vmem:[#allocation3 + $0xc] sm:$0xf] %vm335_vm3, %v559_v45  ;;  %v650_v53 = vpop.permute.xlu1 %649  ;;  %1330 = vmatpush3.xpose.msk.msra.mxu0 %vm227_vm0, %v461_v51  ;;  %1340 = vmatprep.mubr.msk.f32.mxu1 %vm1419_vm4, %v1418_v16 }
 0x176   : > { %1331 = vmatprep.subr.mxu0 %v1418_v16 }
 0x178   : > { %v759_v56 = vpop.permute.xlu0 %758 }
 0x179   : > { %v563_v55 = vld [vmem:[#allocation3] sm:$0xff]  ;;  %1332 = vmatpush3.xpose.msk.msra.mxu0 %vm227_vm0, %v460_v48  ;;  %v765_v58 = vpop.permute.xlu1 %764 }
 0x17a   : > { %646 = vst.msk [vmem:[#allocation3] sm:$0xf] %vm335_vm3, %v645_v54  ;;  %652 = vst.msk [vmem:[#allocation3 + $0x4] sm:$0xf] %vm335_vm3, %v650_v53  ;;  %1343 = vmatprep.subr.mxu0 %v1418_v16 }
 0x17c   : > { %v564_v59 = vld [vmem:[#allocation3 + $0x8] sm:$0xff]  ;;  %1334 = vmatmul.mubr.msk.f32.vlgmr.msra.gmra.mxu0 %vm227_vm0, %v459_v57  ;;  %v753_v60 = vpop.permute.xlu0 %752 }
 0x17d   : > { %658 = vst.msk [vmem:[#allocation3 + $0x8] sm:$0xf] %vm335_vm3, %v656_v49  ;;  %664 = vst.msk [vmem:[#allocation3 + $0xc] sm:$0xf] %vm335_vm3, %v662_v52  ;;  %1337 = vmatpush3.xpose.msk.msra.mxu1 %vm227_vm0, %v564_v59  ;;  %1347 = vmatprep.mubr.msk.f32.mxu0 %vm1419_vm4, %v1418_v16  ;;  %v862_v62 = vpop.permute.xlu1 %861 }
 0x17e   : > { %1338 = vmatprep.subr.mxu1 %v1418_v16 }
 0x180   : > { %v868_v2 = vpop.permute.xlu0 %867 }
 0x181   : > { %v666_v63 = vld [vmem:[#allocation3] sm:$0xff]  ;;  %1339 = vmatpush3.xpose.msk.msra.mxu1 %vm227_vm0, %v563_v55  ;;  %v856_v3 = vpop.permute.xlu1 %855 }
 0x182   : > { %755 = vst.msk [vmem:[#allocation3 + $0x4] sm:$0xf] %vm335_vm3, %v753_v60  ;;  %749 = vst.msk [vmem:[#allocation3] sm:$0xf] %vm335_vm3, %v748_v61  ;;  %1350 = vmatprep.subr.mxu1 %v1418_v16 }
 0x184   : > { %v667_v1 = vld [vmem:[#allocation3 + $0x8] sm:$0xff]  ;;  %1341 = vmatmul.mubr.msk.f32.vlgmr.msra.gmra.mxu1 %vm227_vm0, %v562_v0  ;;  %v965_v7 = vpop.permute.xlu0 %964 }
 0x185   : > { %767 = vst.msk [vmem:[#allocation3 + $0xc] sm:$0xf] %vm335_vm3, %v765_v58  ;;  %761 = vst.msk [vmem:[#allocation3 + $0x8] sm:$0xf] %vm335_vm3, %v759_v56  ;;  %1344 = vmatpush3.xpose.msk.msra.mxu0 %vm227_vm0, %v667_v1  ;;  %1354 = vmatprep.mubr.msk.f32.mxu1 %vm1419_vm4, %v1418_v16  ;;  %v971_v9 = vpop.permute.xlu1 %970 }
 0x186   : > { %1345 = vmatprep.subr.mxu0 %v1418_v16 }
 0x188   : > { %v959_v11 = vpop.permute.xlu0 %958 }
 0x189   : > { %1346 = vmatpush3.xpose.msk.msra.mxu0 %vm227_vm0, %v666_v63  ;;  %v769_v5 = vld [vmem:[#allocation3] sm:$0xff]  ;;  %v1068_v14 = vpop.permute.xlu1 %1067 }
 0x18a   : > { %852 = vst.msk [vmem:[#allocation3] sm:$0xf] %vm335_vm3, %v851_v4  ;;  %858 = vst.msk [vmem:[#allocation3 + $0x4] sm:$0xf] %vm335_vm3, %v856_v3  ;;  %1357 = vmatprep.subr.mxu0 %v1418_v16 }
 0x18c   : > { %v770_v8 = vld [vmem:[#allocation3 + $0x8] sm:$0xff]  ;;  %1348 = vmatmul.mubr.msk.f32.vlgmr.msra.gmra.mxu0 %vm227_vm0, %v665_v6  ;;  %v1074_v21 = vpop.permute.xlu0 %1073 }
 0x18d   : > { %1351 = vmatpush3.xpose.msk.msra.mxu1 %vm227_vm0, %v770_v8  ;;  %864 = vst.msk [vmem:[#allocation3 + $0x8] sm:$0xf] %vm335_vm3, %v862_v62  ;;  %870 = vst.msk [vmem:[#allocation3 + $0xc] sm:$0xf] %vm335_vm3, %v868_v2  ;;  %1361 = vmatprep.mubr.msk.f32.mxu0 %vm1419_vm4, %v1418_v16  ;;  %v1062_v18 = vpop.permute.xlu1 %1061 }
 0x18e   : > { %1352 = vmatprep.subr.mxu1 %v1418_v16 }
 0x191   : > { %1353 = vmatpush3.xpose.msk.msra.mxu1 %vm227_vm0, %v769_v5  ;;  %v872_v12 = vld [vmem:[#allocation3] sm:$0xff] }
 0x192   : > { %955 = vst.msk [vmem:[#allocation3] sm:$0xf] %vm335_vm3, %v954_v10  ;;  %961 = vst.msk [vmem:[#allocation3 + $0x4] sm:$0xf] %vm335_vm3, %v959_v11  ;;  %1364 = vmatprep.subr.mxu1 %v1418_v16 }
 0x194   : > { %v873_v15 = vld [vmem:[#allocation3 + $0x8] sm:$0xff]  ;;  %1355 = vmatmul.mubr.msk.f32.vlgmr.msra.gmra.mxu1 %vm227_vm0, %v768_v13 }
 0x195   : > { %1358 = vmatpush3.xpose.msk.msra.mxu0 %vm227_vm0, %v873_v15  ;;  %967 = vst.msk [vmem:[#allocation3 + $0x8] sm:$0xf] %vm335_vm3, %v965_v7  ;;  %973 = vst.msk [vmem:[#allocation3 + $0xc] sm:$0xf] %vm335_vm3, %v971_v9  ;;  %1368 = vmatprep.mubr.msk.f32.mxu1 %vm1419_vm4, %v1418_v16 }
 0x196   : > { %1359 = vmatprep.subr.mxu0 %v1418_v16 }
 0x199   : > { %1360 = vmatpush3.xpose.msk.msra.mxu0 %vm227_vm0, %v872_v12  ;;  %v975_v19 = vld [vmem:[#allocation3] sm:$0xff] }
 0x19a   : > { %1058 = vst.msk [vmem:[#allocation3] sm:$0xf] %vm335_vm3, %v1057_v17  ;;  %1064 = vst.msk [vmem:[#allocation3 + $0x4] sm:$0xf] %vm335_vm3, %v1062_v18  ;;  %1371 = vmatprep.subr.mxu0 %v1418_v16 }
 0x19c   : > { %v976_v22 = vld [vmem:[#allocation3 + $0x8] sm:$0xff]  ;;  %1362 = vmatmul.mubr.msk.f32.vlgmr.msra.gmra.mxu0 %vm227_vm0, %v871_v20 }
 0x19d   : > { %1365 = vmatpush3.xpose.msk.msra.mxu1 %vm227_vm0, %v976_v22  ;;  %1070 = vst.msk [vmem:[#allocation3 + $0x8] sm:$0xf] %vm335_vm3, %v1068_v14  ;;  %1076 = vst.msk [vmem:[#allocation3 + $0xc] sm:$0xf] %vm335_vm3, %v1074_v21  ;;  %1375 = vmatprep.mubr.msk.f32.mxu0 %vm1419_vm4, %v1418_v16 }
 0x19e   : > { %1366 = vmatprep.subr.mxu1 %v1418_v16 }
 0x1a1   : > { %1367 = vmatpush3.xpose.msk.msra.mxu1 %vm227_vm0, %v975_v19  ;;  %v1078_v25 = vld [vmem:[#allocation3] sm:$0xff] }
 0x1a4   : > { %v1079_v24 = vld [vmem:[#allocation3 + $0x8] sm:$0xff]  ;;  %1369 = vmatmul.mubr.msk.f32.vlgmr.msra.gmra.mxu1 %vm227_vm0, %v974_v23 }
 0x1a5   : > { %1372 = vmatpush3.xpose.msk.msra.mxu0 %vm227_vm0, %v1079_v24 }
 0x1a6   : > { %1373 = vmatprep.subr.mxu0 %v1418_v16 }
 0x1a9   : > { %1374 = vmatpush3.xpose.msk.msra.mxu0 %vm227_vm0, %v1078_v25 }
 0x1ac   : > { %1376 = vmatmul.mubr.msk.f32.vlgmr.msra.gmra.mxu0 %vm227_vm0, %v1077_v26 }
 0x234   : > { %v433_v27 = vpop.f32.mrf.mxu1 }
 0x235   : > { %438 = vst.msk [vmem:[%s221_s12] sm:$0xf] %vm437_vm5, %v433_v27 }
 0x236   : > { %v1328_v28 = vpop.f32.mrf.mxu1 }
 0x23c   : > { %v537_v29 = vpop.f32.mrf.mxu0 }
 0x23d   : > { %541 = vst.msk [vmem:[%s221_s12 + $0x4] sm:$0xf] %vm437_vm5, %v537_v29 }
 0x23e   : > { %v1335_v30 = vpop.f32.mrf.mxu0 }
 0x244   : > { %v640_v16 = vpop.f32.mrf.mxu1 }
 0x245   : > { %644 = vst.msk [vmem:[%s221_s12 + $0x8] sm:$0xf] %vm437_vm5, %v640_v16 }
 0x246   : > { %v1342_v31 = vpop.f32.mrf.mxu1 }
 0x24c   : > { %v743_v32 = vpop.f32.mrf.mxu0 }
 0x24d   : > { %747 = vst.msk [vmem:[%s221_s12 + $0xc] sm:$0xf] %vm437_vm5, %v743_v32 }
 0x24e   : > { %v1349_v33 = vpop.f32.mrf.mxu0 }
 0x254   : > { %v846_v34 = vpop.f32.mrf.mxu1 }
 0x255   : > { %850 = vst.msk [vmem:[%s221_s12 + $0x10] sm:$0xf] %vm437_vm5, %v846_v34 }
 0x256   : > { %v1356_v35 = vpop.f32.mrf.mxu1 }
 0x25c   : > { %v949_v36 = vpop.f32.mrf.mxu0 }
 0x25d   : > { %953 = vst.msk [vmem:[%s221_s12 + $0x14] sm:$0xf] %vm437_vm5, %v949_v36 }
 0x25e   : > { %v1363_v37 = vpop.f32.mrf.mxu0 }
 0x264   : > { %v1052_v38 = vpop.f32.mrf.mxu1 }
 0x265   : > { %1056 = vst.msk [vmem:[%s221_s12 + $0x18] sm:$0xf] %vm437_vm5, %v1052_v38 }
 0x266   : > { %v1370_v39 = vpop.f32.mrf.mxu1 }
 0x26c   : > { %v1155_v40 = vpop.f32.mrf.mxu0 }
 0x26d   : > { %1159 = vst.msk [vmem:[%s221_s12 + $0x1c] sm:$0xf] %vm437_vm5, %v1155_v40 }
 0x26e   : > { %v1377_v41 = vpop.f32.mrf.mxu0 }
 0x26f PF: > { %s20_s20 = sadd.s32 1, %s1412_s20  }
 0x270   : > { %p17_p10 = scmp.ge.s32.totalorder %s20_s20, 4  }
 0x272   :  { %19 = sbr.rel (!%p17_p10) target bundleno = 16 (0x10), region = 68 }

</bundles_post_ra>
